<compile_context>
chip_gen: v6e
topology: v6e:2x2x1
jax: 0.10.0
libtpu: 0.0.40
codegen_flags: <defaults>
</compile_context>

<pallas_src>
import numpy as np
import jax
import jax.numpy as jnp
from jax.experimental import pallas as pl
from jax.experimental.pallas import tpu as pltpu


_LANES = 128
# ~4 MiB per operand block => <= ~24 MiB live with double buffering of
# x / pe / out; comfortably inside v7x's 64 MiB physical VMEM while large
# enough to sit near the HBM roofline on v5e/v6e.
_MAX_BLOCK_BYTES = 4 * 1024 * 1024


def make_positional_encoding(d_model: int, max_len: int = 5000) -> jnp.ndarray:
    """Deterministic parameter setup, mirrors PositionalEncoding.__init__."""
    position = np.arange(0, max_len, dtype=np.float32)[:, None]            # (max_len, 1)
    div_term = np.exp(np.arange(0, d_model, 2, dtype=np.float32)
                      * (-np.log(10000.0) / d_model))                      # (d_model//2,)
    pe = np.zeros((max_len, d_model), dtype=np.float32)
    pe[:, 0::2] = np.sin(position * div_term)
    pe[:, 1::2] = np.cos(position * div_term)
    return jnp.asarray(pe)                                                 # (max_len, d_model)


def _pe_add_kernel(x_ref, pe_ref, o_ref):
    # x_ref/o_ref: (TB, TR, L) block; pe_ref: (TR, L) tile, broadcast over TB.
    o_ref[...] = x_ref[...] + pe_ref[...]


def _pick_tiles(B: int, R: int, L: int, itemsize: int):
    """Largest (tb, tr) with tb*tr*L*itemsize <= _MAX_BLOCK_BYTES."""
    rows_cap = max(8, _MAX_BLOCK_BYTES // (L * itemsize))
    if R <= rows_cap:
        tr = R                                     # full row extent in one block
        tb = max(1, min(B, rows_cap // max(R, 1))) # pack batches into the block too
    else:
        tr = max(8, (rows_cap // 8) * 8)           # sublane-aligned row tile
        tb = 1
    return tb, tr


def _call_kernel(x3: jnp.ndarray, pe2: jnp.ndarray, tb: int, tr: int) -> jnp.ndarray:
    """x3: (B, R, L), pe2: (R, L). Blocks are (tb, tr, L) / (tr, L)."""
    B, R, L = x3.shape
    itemsize = jnp.dtype(x3.dtype).itemsize
    x_block_bytes = tb * tr * L * itemsize
    pe_block_bytes = tr * L * itemsize
    # x and out double-buffered (2 each) + pe double-buffered, plus headroom.
    vmem_limit = int(min(max(4 * x_block_bytes + 2 * pe_block_bytes + (2 << 20),
                             8 << 20), 48 << 20))

    grid = (pl.cdiv(R, tr), pl.cdiv(B, tb))   # batch innermost -> pe tile stays resident

    cost = pl.CostEstimate(
        flops=B * R * L,
        transcendentals=0,
        bytes_accessed=(2 * B * R * L + R * L) * itemsize,
    )

    return pl.pallas_call(
        _pe_add_kernel,
        out_shape=jax.ShapeDtypeStruct((B, R, L), x3.dtype),
        grid_spec=pltpu.PrefetchScalarGridSpec(
            num_scalar_prefetch=0,
            grid=grid,
            in_specs=[
                pl.BlockSpec((tb, tr, L), lambda r, b: (b, r, 0)),  # x slab
                pl.BlockSpec((tr, L), lambda r, b: (r, 0)),         # pe tile (b-invariant)
            ],
            out_specs=pl.BlockSpec((tb, tr, L), lambda r, b: (b, r, 0)),
        ),
        compiler_params=pltpu.CompilerParams(
            dimension_semantics=("parallel", "parallel"),
            vmem_limit_bytes=vmem_limit,
        ),
        cost_estimate=cost,
    )(x3, pe2)


def positional_encoding_forward(x: jnp.ndarray, pe_full: jnp.ndarray) -> jnp.ndarray:
    """x: (B, S, D), pe_full: (max_len, D). Returns x + pe[:S] broadcast over batch."""
    B, S, D = x.shape
    # Do the add in x's dtype (matches the f32 reference exactly; keeps bf16
    # inputs bf16 instead of silently upcasting).
    pe = pe_full[:S, :].astype(x.dtype)
    itemsize = jnp.dtype(x.dtype).itemsize

    total = S * D
    if total % _LANES == 0:
        # Lane-dense path: row-major flatten (S, D) -> (R, 128). Pure layout
        # plumbing — the flatten is identical for x[b] and pe.
        R = total // _LANES
        tb, tr = _pick_tiles(B, R, _LANES, itemsize)
        out = _call_kernel(x.reshape(B, R, _LANES), pe.reshape(R, _LANES), tb, tr)
        return out.reshape(B, S, D)

    # Fallback: per-batch element count not a multiple of 128. Keep D at full
    # extent (legal w.r.t. the (8,128) rule) and tile rows/batch as usual.
    tb, tr = _pick_tiles(B, S, D, itemsize)
    return _call_kernel(x, pe, tb, tr)


if __name__ == "__main__":
    max_len = 5000

    # Primary (lane-dense) path: S*D = 256 -> (B, 2, 128) layout, single grid step.
    B, S, D = 2, 8, 32
    x = jax.random.normal(jax.random.PRNGKey(0), (B, S, D), dtype=jnp.float32)
    pe_full = make_positional_encoding(D, max_len)
    out = jax.block_until_ready(positional_encoding_forward(x, pe_full))
    ref = x + pe_full[None, :S, :]
    np.testing.assert_allclose(np.asarray(out), np.asarray(ref), rtol=1e-6, atol=1e-6)

    # Fallback path (S*D not a multiple of 128): full-extent D blocks.
    B2, S2, D2 = 2, 6, 20
    x2 = jax.random.normal(jax.random.PRNGKey(1), (B2, S2, D2), dtype=jnp.float32)
    pe_full2 = make_positional_encoding(D2, max_len)
    out2 = jax.block_until_ready(positional_encoding_forward(x2, pe_full2))
    ref2 = x2 + pe_full2[None, :S2, :]
    np.testing.assert_allclose(np.asarray(out2), np.asarray(ref2), rtol=1e-6, atol=1e-6)

    print("KERNEL_OK")
</pallas_src>

<mosaic_0001>
module attributes {stable_mosaic.version = 11 : i64} {
  func.func @_pe_add_kernel(%arg0: i32, %arg1: i32, %arg2: memref<2x2x128xf32, #tpu.memory_space<vmem>>, %arg3: memref<2x128xf32, #tpu.memory_space<vmem>>, %arg4: memref<2x2x128xf32, #tpu.memory_space<vmem>>) attributes {dimension_semantics = [#tpu.dimension_semantics<parallel>, #tpu.dimension_semantics<parallel>], iteration_bounds = array<i64: 1, 1>, scalar_prefetch = 0 : i64, scratch_operands = 0 : i64, tpu.core_type = #tpu.core_type<tc>, window_params = [{transform_indices = @transform_0, window_bounds = array<i64: 2, 2, 128>}, {transform_indices = @transform_1, window_bounds = array<i64: 2, 128>}, {transform_indices = @transform_2, window_bounds = array<i64: 2, 2, 128>}]} {
    %c0 = arith.constant 0 : index
    %c0_0 = arith.constant 0 : index
    %c0_1 = arith.constant 0 : index
    %0 = vector.load %arg2[%c0, %c0_0, %c0_1] : memref<2x2x128xf32, #tpu.memory_space<vmem>>, vector<2x2x128xf32>
    %c0_2 = arith.constant 0 : index
    %c0_3 = arith.constant 0 : index
    %1 = vector.load %arg3[%c0_2, %c0_3] : memref<2x128xf32, #tpu.memory_space<vmem>>, vector<2x128xf32>
    %2 = vector.shape_cast %1 : vector<2x128xf32> to vector<1x2x128xf32>
    %3 = vector.broadcast %2 : vector<1x2x128xf32> to vector<2x2x128xf32>
    %4 = arith.addf %0, %3 : vector<2x2x128xf32>
    %c0_4 = arith.constant 0 : index
    %c0_5 = arith.constant 0 : index
    %c0_6 = arith.constant 0 : index
    %5 = vector.load %arg4[%c0_4, %c0_5, %c0_6] : memref<2x2x128xf32, #tpu.memory_space<vmem>>, vector<2x2x128xf32>
    tpu.vector_store %arg4[%c0_4, %c0_5, %c0_6], %4 {strides = array<i32>} : memref<2x2x128xf32, #tpu.memory_space<vmem>>, vector<2x2x128xf32>,
    return
  }
  func.func @transform_0(%arg0: i32, %arg1: i32) -> (i32, i32, i32) {
    %c0_i32 = arith.constant 0 : i32
    %c0_i32_0 = arith.constant 0 : i32
    return %arg1, %arg0, %c0_i32 : i32, i32, i32
  }
  func.func @transform_1(%arg0: i32, %arg1: i32) -> (i32, i32) {
    %c0_i32 = arith.constant 0 : i32
    %c0_i32_0 = arith.constant 0 : i32
    return %arg0, %c0_i32 : i32, i32
  }
  func.func @transform_2(%arg0: i32, %arg1: i32) -> (i32, i32, i32) {
    %c0_i32 = arith.constant 0 : i32
    %c0_i32_0 = arith.constant 0 : i32
    return %arg1, %arg0, %c0_i32 : i32, i32, i32
  }
}

</mosaic_0001>

<bundles_post_ra>
// kernel: tpu_custom_call.1
= control target key start
LH: loop header
LB: loop body
LE: loop exit
PB: predicated region body
PF: predicated region fallthrough
CT: control target
= control target key end

     0   :  { %7 = vsyncpa [#allocation3], 0  ;;  %s169_s0 = inlined_call_operand.hbm [shape: f32[2,2,128], index: 0, kind: input, shape index: {}]   ;;  %s170_s1 = inlined_call_operand.hbm [shape: f32[2,128], index: 1, kind: input, shape index: {}]   ;;  %s171_s2 = inlined_call_operand.hbm [shape: f32[2,2,128], index: 2, kind: output, shape index: {}]  }
   0x1   :  { %8 = vsyncpa [#allocation6], 0 }
   0x2   :  { %9 = vsyncpa [#allocation4], 0  ;;  %s134_s9 = smov [#allocation2]  }
   0x3   :  { %s15_s10 = sshll.u32 %s134_s9, 4  ;;  %s16_s10 = int_to_ptr.vmem [resolvable:$true] %s15_s10 }
   0x4   :  { %s76_s11 = scalar_lea.vmem %s16_s10, 64  ;;  %p81_p1 = scmp.lt.s32.totalorder %s16_s10, %s16_s10 }
   0x5   :  { %p77_p0 = scmp.ne.s32.totalorder %s16_s10, %s76_s11  ;;  %p82_p2 = scmp.lt.s32.totalorder %s76_s11, %s76_s11 }
   0x7   :  { %p83_p3 = por %p82_p2, %p81_p1 }
   0x9   :  { %p84_p4 = pnand %p83_p3, %p77_p0 }
   0xb   :  { %87 = shalt.err (!%p84_p4)
}
   0xc   :  { %s135_s12 = smov 32   ;;  %s136_s13 = smov 2  }
   0xd   :  { %21 = dma.hbm_to_vmem [thread:$0]  %s169_s0, 64, %s16_s10, [#allocation3], %s135_s12, %s135_s12, %s136_s13  }
   0xe   :  { %s137_s16 = smov [#allocation5]  }
   0xf   :  { %s28_s17 = sshll.u32 %s137_s16, 4  ;;  %s29_s17 = int_to_ptr.vmem [resolvable:$true] %s28_s17 }
  0x10   :  { %s96_s18 = scalar_lea.vmem %s29_s17, 32  ;;  %p101_p6 = scmp.lt.s32.totalorder %s29_s17, %s29_s17 }
  0x11   :  { %p97_p5 = scmp.ne.s32.totalorder %s29_s17, %s96_s18  ;;  %p102_p7 = scmp.lt.s32.totalorder %s96_s18, %s96_s18 }
  0x13   :  { %p103_p8 = por %p102_p7, %p101_p6 }
  0x15   :  { %p104_p9 = pnand %p103_p8, %p97_p5 }
  0x17   :  { %107 = shalt.err (!%p104_p9)
}
  0x18   :  { %31 = dma.hbm_to_vmem [thread:$0]  %s170_s1, 32, %s29_s17, [#allocation6]  }
  0x19   :  { %128 = dma.done.wait [#allocation3], 64  }
  0x1a   :  { %129 = vsyncadd [#allocation3], 4294967232 }
  0x1b   :  { %130 = dma.done.wait [#allocation6], 32  }
  0x1c   :  { %131 = vsyncadd [#allocation6], 4294967264  ;;  %s138_s21 = smov [#allocation7]   ;;  %v38_v0 = vld [vmem:[#allocation2] sm:$0x3] }
  0x1d   :  { %s50_s0 = sshll.u32 %s138_s21, 4  ;;  %v40_v1 = vld [vmem:[#allocation5] sm:$0x3]  ;;  %v39_v2 = vld [vmem:[#allocation2 + $0x2] sm:$0x3]  ;;  %s51_s0 = int_to_ptr.vmem [resolvable:$true] %s50_s0 }
  0x1e   :  { %v41_v3 = vadd.f32 %v40_v1, %v38_v0  ;;  %v42_v4 = vadd.f32 %v40_v1, %v39_v2  ;;  %s108_s22 = scalar_lea.vmem %s51_s0, 64  ;;  %p113_p11 = scmp.lt.s32.totalorder %s51_s0, %s51_s0 }
  0x1f   :  { %p109_p10 = scmp.ne.s32.totalorder %s51_s0, %s108_s22  ;;  %p114_p12 = scmp.lt.s32.totalorder %s108_s22, %s108_s22 }
  0x20   :  { %43 = vst [vmem:[#allocation7] sm:$0x3] %v41_v3  ;;  %44 = vst [vmem:[#allocation7 + $0x2] sm:$0x3] %v42_v4 }
  0x21   :  { %p115_p13 = por %p114_p12, %p113_p11 }
  0x23   :  { %p116_p0 = pnand %p115_p13, %p109_p10 }
  0x25   :  { %119 = shalt.err (!%p116_p0)
}
  0x26   :  { %56 = dma.vmem_to_hbm [thread:$0]  %s51_s0, 64, %s171_s2, [#allocation4], %s135_s12, %s135_s12, %s136_s13  }
  0x27   :  { %132 = dma.done.wait [#allocation4], 64  }
  0x28   :  { %133 = vsyncadd [#allocation4], 4294967232 }
  0x29   :  { %60 = vsyncpa [#allocation3], 1 }
  0x2a   :  { %61 = vsyncpa [#allocation6], 1 }
  0x2b   :  { %62 = vsyncpa [#allocation4], 1 }

</bundles_post_ra>
